<compile_context>
chip_gen: v7x
topology: tpu7x:2x2x1
jax: 0.10.0
libtpu: 0.0.40
codegen_flags: <defaults>
</compile_context>

<pallas_src>
import functools

import jax
import jax.numpy as jnp
from jax import lax
from jax.experimental import pallas as pl
from jax.experimental.pallas import tpu as pltpu

_LANES = 128
_SUBLANES = 8
_MAX_TILE_ROWS = 4096                # cap: keeps f32 compute temps ~2 MiB each
_STREAM_VMEM_BUDGET = 8 * 1024 * 1024  # 2 inputs x 2 pipeline buffers budget
_NUM_CORE_SPLITS = 2                 # "parallel" leading axis -> both TCs on v7x
_VMEM_LIMIT_BYTES = 32 * 1024 * 1024


def _round_up(x: int, m: int) -> int:
    return ((x + m - 1) // m) * m


def _round_down(x: int, m: int) -> int:
    return (x // m) * m


def _pointwise_loss(p, t, *, with_logits: bool, hard_label: bool):
    """Elementwise BCE loss in f32 (PyTorch semantics, logs clamped to -100)."""
    p = p.astype(jnp.float32)
    t = t.astype(jnp.float32)
    if with_logits:
        # BCEWithLogitsLoss: max(x,0) - x*t + log(1 + exp(-|x|))
        return jnp.maximum(p, 0.0) - p * t + jnp.log1p(jnp.exp(-jnp.abs(p)))
    if hard_label:
        # Integer/bool targets in {0,1}: one log per element instead of two.
        sel = jnp.where(t > 0.5, p, 1.0 - p)
        return -jnp.maximum(jnp.log(sel), -100.0)
    # Soft (float) targets: -(t*log(p) + (1-t)*log(1-p)), logs clamped.
    log_p = jnp.maximum(jnp.log(p), -100.0)
    log_1mp = jnp.maximum(jnp.log(1.0 - p), -100.0)
    return -(t * log_p + (1.0 - t) * log_1mp)


def _bce_sum_kernel(p_ref, t_ref, out_ref, acc_ref, *,
                    with_logits: bool, hard_label: bool,
                    tile_rows: int, tiles_per_core: int,
                    valid_rows: int, needs_mask: bool):
    c = pl.program_id(0)   # core-split axis ("parallel")
    i = pl.program_id(1)   # row-tile axis ("arbitrary", accumulator carried)

    @pl.when(i == 0)
    def _init():
        acc_ref[...] = jnp.zeros_like(acc_ref)

    loss = _pointwise_loss(p_ref[...], t_ref[...],
                           with_logits=with_logits, hard_label=hard_label)

    if needs_mask:
        # Zero rows past the end of the array (partial last tile) and whole
        # phantom tiles on the second core when the tile count is odd.  A
        # select (not multiply) so garbage/NaN in over-read rows is harmless.
        g = c * tiles_per_core + i                       # global tile index
        limit = valid_rows - g * tile_rows               # rows valid this step
        row_ids = lax.broadcasted_iota(jnp.int32, (tile_rows, _LANES), 0)
        loss = jnp.where(row_ids < limit, loss, 0.0)

    # Fold the whole tile into one vreg with pure VPU adds (no XLU, no big
    # accumulator traffic): (tile_rows,128) -> (tile_rows/8, 8, 128) -> (8,128)
    acc_ref[...] += loss.reshape(-1, _SUBLANES, _LANES).sum(axis=0)

    @pl.when(i == pl.num_programs(1) - 1)
    def _finalize():
        out_ref[...] = acc_ref[...].reshape(1, _SUBLANES, _LANES)


def _bce_block_sum(p2, t2, *, with_logits: bool, hard_label: bool,
                   tile_rows: int, num_cores: int, tiles_per_core: int,
                   num_tiles: int):
    """Sum of elementwise BCE loss over a (rows, 128) view via the kernel."""
    rows = p2.shape[0]
    coverage_rows = num_cores * tiles_per_core * tile_rows
    needs_mask = coverage_rows != rows

    if num_cores * tiles_per_core > num_tiles:
        # Phantom tiles on the second core: clamp the block index in-bounds;
        # their rows are fully masked inside the kernel.
        def in_map(c, i):
            return (jnp.minimum(c * tiles_per_core + i, num_tiles - 1), 0)
    else:
        def in_map(c, i):
            return (c * tiles_per_core + i, 0)

    kernel = functools.partial(
        _bce_sum_kernel, with_logits=with_logits, hard_label=hard_label,
        tile_rows=tile_rows, tiles_per_core=tiles_per_core,
        valid_rows=rows, needs_mask=needs_mask)

    partials = pl.pallas_call(
        kernel,
        out_shape=jax.ShapeDtypeStruct((num_cores, _SUBLANES, _LANES),
                                       jnp.float32),
        grid_spec=pltpu.PrefetchScalarGridSpec(
            num_scalar_prefetch=0,
            grid=(num_cores, tiles_per_core),
            in_specs=[
                pl.BlockSpec((tile_rows, _LANES), in_map),
                pl.BlockSpec((tile_rows, _LANES), in_map),
            ],
            out_specs=pl.BlockSpec((1, _SUBLANES, _LANES),
                                   lambda c, i: (c, 0, 0)),
            scratch_shapes=[pltpu.VMEM((_SUBLANES, _LANES), jnp.float32)],
        ),
        compiler_params=pltpu.CompilerParams(
            dimension_semantics=("parallel", "arbitrary"),
            vmem_limit_bytes=_VMEM_LIMIT_BYTES,
        ),
    )(p2, t2)
    return jnp.sum(partials)


def _squeeze_like_torch(predictions, targets):
    # Mirrors: if preds is [B,1,H,W] and targets is [B,H,W] -> preds[:,0,:,:]
    if predictions.ndim == 4 and targets.ndim == 3 and predictions.shape[1] == 1:
        predictions = predictions[:, 0, :, :]
    return predictions, targets


def binary_cross_entropy_loss(predictions, targets, *, with_logits: bool = False):
    """Pallas equivalent of BinaryCrossEntropyLoss.forward (mean reduction).

    Best HBM efficiency when predictions are bf16 and targets int8/bool/int32;
    the f32 cast happens inside the kernel (do NOT pre-cast in the wrapper).
    """
    predictions, targets = _squeeze_like_torch(predictions, targets)

    n = int(predictions.size)
    if n == 0:
        # Mean over an empty tensor: mirror PyTorch's 0/0 -> NaN.
        return jnp.array(jnp.nan, dtype=jnp.float32)

    hard_label = bool(jnp.issubdtype(targets.dtype, jnp.integer)
                      or targets.dtype == jnp.bool_)

    flat_p = predictions.reshape(-1)   # native dtype — cast happens in-kernel
    flat_t = targets.reshape(-1)

    # Largest tile such that 2 inputs x 2 pipeline buffers fit the VMEM budget.
    bytes_per_row = _LANES * (flat_p.dtype.itemsize + flat_t.dtype.itemsize)
    tile_max = _STREAM_VMEM_BUDGET // (2 * bytes_per_row)
    tile_max = max(32, min(_MAX_TILE_ROWS, _round_down(tile_max, 32)))

    r_full = n // _LANES               # complete 128-lane rows

    if r_full < _SUBLANES:
        # ---- tiny inputs (< 1024 elements): loss-neutral pad to one tile ----
        rp = max(_SUBLANES, _round_up(pl.cdiv(n, _LANES), _SUBLANES))
        n_pad = rp * _LANES - n
        if with_logits:
            p_pad, t_pad = -1.0e4, 0   # exp underflows -> loss == 0 exactly
        else:
            p_pad, t_pad = 1.0, 1      # log(1)=0, other term multiplied by 0
        flat_p = jnp.concatenate(
            [flat_p, jnp.full((n_pad,), p_pad, flat_p.dtype)])
        flat_t = jnp.concatenate(
            [flat_t, jnp.full((n_pad,), t_pad, flat_t.dtype)])
        total = _bce_block_sum(
            flat_p.reshape(rp, _LANES), flat_t.reshape(rp, _LANES),
            with_logits=with_logits, hard_label=hard_label,
            tile_rows=rp, num_cores=1, tiles_per_core=1, num_tiles=1)
        return total / n

    if r_full <= tile_max:
        # Single tile: trim to a multiple of 8 rows so block == full array dims
        # (leftover <8 rows join the plain-JAX tail below).
        r_kernel = _round_down(r_full, _SUBLANES)
        tile_rows = r_kernel
        num_tiles, num_cores, tiles_per_core = 1, 1, 1
    else:
        # Multi-tile: all full rows go through the kernel; partial last tile
        # (and any phantom tile from the 2-way core split) is masked in-kernel.
        r_kernel = r_full
        tile_rows = tile_max
        num_tiles = pl.cdiv(r_kernel, tile_rows)
        num_cores = _NUM_CORE_SPLITS if num_tiles >= _NUM_CORE_SPLITS else 1
        tiles_per_core = pl.cdiv(num_tiles, num_cores)

    n_kernel = r_kernel * _LANES
    if n_kernel == n:
        p_main = flat_p.reshape(r_kernel, _LANES)     # zero-copy view
        t_main = flat_t.reshape(r_kernel, _LANES)
    else:
        # Rare (ragged) case: prefix slice materializes once; the tail below
        # stays tiny (< 8*128 + 127 elements) and is summed in plain JAX.
        p_main = flat_p[:n_kernel].reshape(r_kernel, _LANES)
        t_main = flat_t[:n_kernel].reshape(r_kernel, _LANES)

    total = _bce_block_sum(
        p_main, t_main, with_logits=with_logits, hard_label=hard_label,
        tile_rows=tile_rows, num_cores=num_cores,
        tiles_per_core=tiles_per_core, num_tiles=num_tiles)

    if n_kernel != n:
        tail_loss = _pointwise_loss(flat_p[n_kernel:], flat_t[n_kernel:],
                                    with_logits=with_logits,
                                    hard_label=hard_label)
        total = total + jnp.sum(tail_loss)

    return total / n


def _reference(predictions, targets, *, with_logits):
    predictions, targets = _squeeze_like_torch(predictions, targets)
    p = predictions.astype(jnp.float32)
    t = targets.astype(jnp.float32)
    if with_logits:
        loss = jnp.maximum(p, 0.0) - p * t + jnp.log1p(jnp.exp(-jnp.abs(p)))
    else:
        loss = -(t * jnp.maximum(jnp.log(p), -100.0)
                 + (1.0 - t) * jnp.maximum(jnp.log(1.0 - p), -100.0))
    return jnp.mean(loss)


if __name__ == "__main__":
    key = jax.random.PRNGKey(0)
    keys = jax.random.split(key, 8)

    B, C = 2, 4  # predictions: [B, class_count]

    # 1) small classification: probabilities + integer hard labels (BCELoss path)
    preds_prob = jax.nn.sigmoid(jax.random.normal(keys[0], (B, C), jnp.float32))
    targets_int = (jax.random.uniform(keys[1], (B, C)) > 0.5).astype(jnp.int32)
    out1 = binary_cross_entropy_loss(preds_prob, targets_int, with_logits=False)
    jax.block_until_ready(out1)
    ref1 = _reference(preds_prob, targets_int, with_logits=False)
    assert jnp.allclose(out1, ref1, atol=1e-5, rtol=1e-5), (out1, ref1)

    # 2) small classification: bf16 logits streamed in native dtype (BCEWithLogits)
    preds_logit = (jax.random.normal(keys[2], (B, C), jnp.float32) * 3.0
                   ).astype(jnp.bfloat16)
    out2 = binary_cross_entropy_loss(preds_logit, targets_int, with_logits=True)
    jax.block_until_ready(out2)
    ref2 = _reference(preds_logit, targets_int, with_logits=True)
    assert jnp.allclose(out2, ref2, atol=1e-5, rtol=1e-5), (out2, ref2)

    # 3) [B,1,H,W] predictions vs [B,H,W] targets squeeze branch, float targets
    H = W = 16
    preds4 = jax.nn.sigmoid(jax.random.normal(keys[3], (B, 1, H, W), jnp.float32))
    targets3 = (jax.random.uniform(keys[4], (B, H, W)) > 0.5).astype(jnp.float32)
    out3 = binary_cross_entropy_loss(preds4, targets3, with_logits=False)
    jax.block_until_ready(out3)
    ref3 = _reference(preds4, targets3, with_logits=False)
    assert jnp.allclose(out3, ref3, atol=1e-5, rtol=1e-5), (out3, ref3)

    # 4) ragged medium: single-tile kernel body + plain-JAX lane/row tail
    preds_r = jax.nn.sigmoid(jax.random.normal(keys[5], (3, 1000), jnp.float32))
    targets_r = jax.random.uniform(keys[6], (3, 1000), jnp.float32)  # soft labels
    out4 = binary_cross_entropy_loss(preds_r, targets_r, with_logits=False)
    jax.block_until_ready(out4)
    ref4 = _reference(preds_r, targets_r, with_logits=False)
    assert jnp.allclose(out4, ref4, atol=1e-5, rtol=1e-5), (out4, ref4)

    # 5) larger run: multi-tile grid, 2-way core split, partial + phantom tile
    #    masking (160*8192 = 1,310,720 elems -> 10240 rows -> 3 tiles of 4096)
    preds_l = jax.random.normal(keys[7], (160, 8192), jnp.float32) * 2.0
    targets_l = (jax.random.uniform(keys[1], (160, 8192)) > 0.5
                 ).astype(jnp.float32)
    out5 = binary_cross_entropy_loss(preds_l, targets_l, with_logits=True)
    jax.block_until_ready(out5)
    ref5 = _reference(preds_l, targets_l, with_logits=True)
    assert jnp.allclose(out5, ref5, atol=1e-4, rtol=1e-4), (out5, ref5)

    print("KERNEL_OK")
</pallas_src>

<mosaic_0001>
module attributes {stable_mosaic.version = 11 : i64} {
  func.func @_bce_sum_kernel(%arg0: i32, %arg1: i32, %arg2: memref<8x128xf32, #tpu.memory_space<vmem>>, %arg3: memref<8x128xi32, #tpu.memory_space<vmem>>, %arg4: memref<1x8x128xf32, #tpu.memory_space<vmem>>, %arg5: memref<8x128xf32, #tpu.memory_space<vmem>>) attributes {dimension_semantics = [#tpu.dimension_semantics<parallel>, #tpu.dimension_semantics<arbitrary>], iteration_bounds = array<i64: 1, 1>, scalar_prefetch = 0 : i64, scratch_operands = 1 : i64, tpu.core_type = #tpu.core_type<tc>, window_params = [{transform_indices = @transform_0, window_bounds = array<i64: 8, 128>}, {transform_indices = @transform_1, window_bounds = array<i64: 8, 128>}, {transform_indices = @transform_2, window_bounds = array<i64: 1, 8, 128>}]} {
    %c0_i32 = arith.constant 0 : i32
    %0 = arith.cmpi eq, %arg1, %c0_i32 : i32
    %1 = arith.extui %0 : i1 to i32
    %c0_i32_0 = arith.constant 0 : i32
    %2 = arith.cmpi ne, %1, %c0_i32_0 : i32
    scf.if %2 {
      %cst_14 = arith.constant 0.000000e+00 : f32
      %24 = vector.broadcast %cst_14 : f32 to vector<8x128xf32>
      %c0_15 = arith.constant 0 : index
      %c0_16 = arith.constant 0 : index
      %25 = vector.load %arg5[%c0_15, %c0_16] : memref<8x128xf32, #tpu.memory_space<vmem>>, vector<8x128xf32>
      tpu.vector_store %arg5[%c0_15, %c0_16], %24 {strides = array<i32>} : memref<8x128xf32, #tpu.memory_space<vmem>>, vector<8x128xf32>,
    } else {
    }
    %c0 = arith.constant 0 : index
    %c0_1 = arith.constant 0 : index
    %3 = vector.load %arg2[%c0, %c0_1] : memref<8x128xf32, #tpu.memory_space<vmem>>, vector<8x128xf32>
    %c0_2 = arith.constant 0 : index
    %c0_3 = arith.constant 0 : index
    %4 = vector.load %arg3[%c0_2, %c0_3] : memref<8x128xi32, #tpu.memory_space<vmem>>, vector<8x128xi32>
    %5 = arith.sitofp %4 : vector<8x128xi32> to vector<8x128xf32>
    %cst = arith.constant 5.000000e-01 : f32
    %6 = vector.broadcast %cst : f32 to vector<8x128xf32>
    %7 = arith.cmpf ogt, %5, %6 : vector<8x128xf32>
    %cst_4 = arith.constant 1.000000e+00 : f32
    %8 = vector.broadcast %cst_4 : f32 to vector<8x128xf32>
    %9 = arith.subf %8, %3 : vector<8x128xf32>
    %10 = arith.select %7, %3, %9 : vector<8x128xi1>, vector<8x128xf32>
    %11 = math.log %10 : vector<8x128xf32>
    %cst_5 = arith.constant -1.000000e+02 : f32
    %12 = vector.broadcast %cst_5 : f32 to vector<8x128xf32>
    %13 = arith.maximumf %11, %12 : vector<8x128xf32>
    %cst_6 = arith.constant 0.000000e+00 : f32
    %14 = vector.broadcast %cst_6 : f32 to vector<8x128xf32>
    %15 = arith.subf %14, %13 : vector<8x128xf32>
    %c0_7 = arith.constant 0 : index
    %c0_8 = arith.constant 0 : index
    %16 = vector.load %arg5[%c0_7, %c0_8] : memref<8x128xf32, #tpu.memory_space<vmem>>, vector<8x128xf32>
    %17 = vector.shape_cast %15 : vector<8x128xf32> to vector<1x8x128xf32>
    %cst_9 = arith.constant dense<0.000000e+00> : vector<8x128xf32>
    %18 = vector.multi_reduction <add>, %17, %cst_9 [0] : vector<1x8x128xf32> to vector<8x128xf32>
    %19 = arith.addf %16, %18 : vector<8x128xf32>
    %c0_10 = arith.constant 0 : index
    %c0_11 = arith.constant 0 : index
    %20 = vector.load %arg5[%c0_10, %c0_11] : memref<8x128xf32, #tpu.memory_space<vmem>>, vector<8x128xf32>
    tpu.vector_store %arg5[%c0_10, %c0_11], %19 {strides = array<i32>} : memref<8x128xf32, #tpu.memory_space<vmem>>, vector<8x128xf32>,
    %c0_i32_12 = arith.constant 0 : i32
    %21 = arith.cmpi eq, %arg1, %c0_i32_12 : i32
    %22 = arith.extui %21 : i1 to i32
    %c0_i32_13 = arith.constant 0 : i32
    %23 = arith.cmpi ne, %22, %c0_i32_13 : i32
    scf.if %23 {
      %c0_14 = arith.constant 0 : index
      %c0_15 = arith.constant 0 : index
      %24 = vector.load %arg5[%c0_14, %c0_15] : memref<8x128xf32, #tpu.memory_space<vmem>>, vector<8x128xf32>
      %25 = vector.shape_cast %24 : vector<8x128xf32> to vector<1x8x128xf32>
      %c0_16 = arith.constant 0 : index
      %c0_17 = arith.constant 0 : index
      %c0_18 = arith.constant 0 : index
      %26 = vector.load %arg4[%c0_16, %c0_17, %c0_18] : memref<1x8x128xf32, #tpu.memory_space<vmem>>, vector<1x8x128xf32>
      tpu.vector_store %arg4[%c0_16, %c0_17, %c0_18], %25 {strides = array<i32>} : memref<1x8x128xf32, #tpu.memory_space<vmem>>, vector<1x8x128xf32>,
    } else {
    }
    return
  }
  func.func @transform_0(%arg0: i32, %arg1: i32) -> (i32, i32) {
    %c1_i32 = arith.constant 1 : i32
    %0 = arith.muli %arg0, %c1_i32 : i32
    %1 = arith.addi %0, %arg1 : i32
    %c0_i32 = arith.constant 0 : i32
    %c0_i32_0 = arith.constant 0 : i32
    return %1, %c0_i32 : i32, i32
  }
  func.func @transform_1(%arg0: i32, %arg1: i32) -> (i32, i32) {
    %c1_i32 = arith.constant 1 : i32
    %0 = arith.muli %arg0, %c1_i32 : i32
    %1 = arith.addi %0, %arg1 : i32
    %c0_i32 = arith.constant 0 : i32
    %c0_i32_0 = arith.constant 0 : i32
    return %1, %c0_i32 : i32, i32
  }
  func.func @transform_2(%arg0: i32, %arg1: i32) -> (i32, i32, i32) {
    %c0_i32 = arith.constant 0 : i32
    %c0_i32_0 = arith.constant 0 : i32
    %c0_i32_1 = arith.constant 0 : i32
    return %arg0, %c0_i32, %c0_i32_0 : i32, i32, i32
  }
}

</mosaic_0001>

<bundles_post_ra>
// kernel: tpu_custom_call.1
= control target key start
LH: loop header
LB: loop body
LE: loop exit
PB: predicated region body
PF: predicated region fallthrough
CT: control target
= control target key end

     0   :  { %7 = vsyncpa [#allocation4], 0  ;;  %s215_s0 = inlined_call_operand.hbm [shape: f32[8,128], index: 0, kind: input, shape index: {}]   ;;  %s216_s1 = inlined_call_operand.hbm [shape: s32[8,128], index: 1, kind: input, shape index: {}]   ;;  %s217_s2 = inlined_call_operand.hbm [shape: f32[1,8,128], index: 2, kind: output, shape index: {}]  }
   0x1   :  { %8 = vsyncpa [#allocation7], 0 }
   0x2   :  { %9 = vsyncpa [#allocation5], 0  ;;  %s161_s9 = smov [#allocation3]   ;;  %s162_s11 = smov [#allocation6]  }
   0x3   :  { %s19_s10 = sshll.u32 %s161_s9, 4  ;;  %s32_s12 = sshll.u32 %s162_s11, 4  ;;  %s20_s10 = int_to_ptr.vmem [resolvable:$true] %s19_s10  ;;  %s33_s12 = int_to_ptr.vmem [resolvable:$true] %s32_s12 }
   0x4   :  { %s89_s15 = scalar_lea.hbm %s215_s0, 128 }
   0x5   :  { %p90_p0 = scmp.ne.s32.totalorder %s215_s0, %s89_s15  ;;  %p93_p1 = scmp.lt.u32.totalorder %s89_s15, %s215_s0 }
   0x7   :  { %p95_p2 = pnand %p93_p1, %p90_p0 }
   0x9   :  { %98 = shalt.err (!%p95_p2)
}
   0xa   :  { %s99_s20 = scalar_lea.vmem %s20_s10, 128  ;;  %p104_p4 = scmp.lt.s32.totalorder %s20_s10, %s20_s10 }
   0xb   :  { %p100_p3 = scmp.ne.s32.totalorder %s20_s10, %s99_s20  ;;  %p105_p5 = scmp.lt.s32.totalorder %s99_s20, %s99_s20 }
   0xd   :  { %p106_p6 = por %p105_p5, %p104_p4 }
   0xf   :  { %p107_p7 = pnand %p106_p6, %p100_p3 }
  0x11   :  { %110 = shalt.err (!%p107_p7)
}
  0x12   :  { %22 = dma.hbm_to_vmem [thread:$0]  %s215_s0, 128, %s20_s10, [#allocation4]  }
  0x13   :  { %s111_s25 = scalar_lea.hbm %s216_s1, 128 }
  0x14   :  { %p112_p8 = scmp.ne.s32.totalorder %s216_s1, %s111_s25  ;;  %p115_p9 = scmp.lt.u32.totalorder %s111_s25, %s216_s1 }
  0x16   :  { %p117_p10 = pnand %p115_p9, %p112_p8 }
  0x18   :  { %120 = shalt.err (!%p117_p10)
}
  0x19   :  { %s121_s30 = scalar_lea.vmem %s33_s12, 128  ;;  %p126_p12 = scmp.lt.s32.totalorder %s33_s12, %s33_s12 }
  0x1a   :  { %p122_p11 = scmp.ne.s32.totalorder %s33_s12, %s121_s30  ;;  %p127_p13 = scmp.lt.s32.totalorder %s121_s30, %s121_s30 }
  0x1c   :  { %p128_p0 = por %p127_p13, %p126_p12 }
  0x1e   :  { %p129_p1 = pnand %p128_p0, %p122_p11 }
  0x20   :  { %132 = shalt.err (!%p129_p1)
}
  0x21   :  { %35 = dma.hbm_to_vmem [thread:$0]  %s216_s1, 128, %s33_s12, [#allocation7]  }
  0x22   :  { %155 = dma.done.wait [#allocation4], 128  }
  0x23   :  { %156 = vsyncadd [#allocation4], 4294967168 }
  0x24   :  { %157 = dma.done.wait [#allocation7], 128  }
  0x25   :  { %158 = vsyncadd [#allocation7], 4294967168  ;;  %v49_v0 = vld [vmem:[#allocation3] sm:$0xff]  ;;  %v50_v1 = vld [vmem:[#allocation6] sm:$0xff]  ;;  %s163_s4 = smov [#allocation8]  }
  0x26   :  { %v51_v2 = vcvt.s32.f32 %v50_v1  ;;  %v53_v3 = vsub.f32 1.0, %v49_v0  ;;  %s74_s5 = sshll.u32 %s163_s4, 4  ;;  %s75_s5 = int_to_ptr.vmem [resolvable:$true] %s74_s5 }
  0x27   :  { %s133_s1 = scalar_lea.vmem %s75_s5, 128  ;;  %p138_p3 = scmp.lt.s32.totalorder %s75_s5, %s75_s5 }
  0x28   :  { %vm52_vm0 = vcmp.gt.f32.partialorder %v51_v2, 0.5  ;;  %p134_p2 = scmp.ne.s32.totalorder %s75_s5, %s133_s1  ;;  %p139_p4 = scmp.lt.s32.totalorder %s133_s1, %s133_s1 }
  0x29   :  { %v54_v4 = vsel %vm52_vm0, %v49_v0, %v53_v3 }
  0x2a   :  { %87 = vlog2.f32 %v54_v4  ;;  %p140_p5 = por %p139_p4, %p138_p3 }
  0x2c   :  { %p141_p6 = pnand %p140_p5, %p134_p2 }
  0x34   :  { %v88_v5 = vpop.eup %87 }
  0x35   :  { %v56_v6 = vmul.f32 0.6931472, %v88_v5 }
  0x37   :  { %v57_v7 = vmax.f32 %v56_v6, -100.0 }
  0x39   :  { %v58_v8 = vsub.f32 0.0, %v57_v7 }
  0x3b   :  { %67 = vst [vmem:[#allocation8] sm:$0xff] %v58_v8 }
  0x3c   :  { %144 = shalt.err (!%p141_p6)
}
  0x3d   :  { %s145_s8 = scalar_lea.hbm %s217_s2, 128 }
  0x3e   :  { %p146_p7 = scmp.ne.s32.totalorder %s217_s2, %s145_s8  ;;  %p149_p8 = scmp.lt.u32.totalorder %s145_s8, %s217_s2 }
  0x40   :  { %p151_p9 = pnand %p149_p8, %p146_p7 }
  0x42   :  { %154 = shalt.err (!%p151_p9)
}
  0x43   :  { %77 = dma.vmem_to_hbm [thread:$0]  %s75_s5, 128, %s217_s2, [#allocation5]  }
  0x44   :  { %159 = dma.done.wait [#allocation5], 128  }
  0x45   :  { %160 = vsyncadd [#allocation5], 4294967168 }
  0x46   :  { %81 = vsyncpa [#allocation4], 1 }
  0x47   :  { %82 = vsyncpa [#allocation7], 1 }
  0x48   :  { %83 = vsyncpa [#allocation5], 1 }

</bundles_post_ra>
